<compile_context>
chip_gen: v6e
topology: v6e:2x2x1
jax: 0.10.0
libtpu: 0.0.40
codegen_flags: <defaults>
</compile_context>

<pallas_src>
import numpy as np
import jax
import jax.numpy as jnp
from jax.experimental import pallas as pl
from jax.experimental.pallas import tpu as pltpu

LOGSTD_MAX = 2.0
LOGSTD_MIN = -10.0

_LANE = 128
_SUBLANE = 8


def _round_up(n, m):
    return ((n + m - 1) // m) * m


# ------------------------------------------------------------------
# Deterministic parameter init (matches torch orthogonal_ + constant_
# semantics; not bit-identical to torch's RNG stream).
# ------------------------------------------------------------------
def _orthogonal(rng, rows, cols, gain):
    a = rng.normal(size=(max(rows, cols), min(rows, cols)))
    q, r = np.linalg.qr(a)
    q = q * np.sign(np.diag(r))          # deterministic sign convention
    if rows < cols:
        q = q.T
    return (gain * q[:rows, :cols]).astype(np.float32)


def make_params(num_inputs, num_outputs, seed=0):
    """Logical (unpadded) parameters, weights stored as [fin, fout]."""
    h1 = num_inputs * 10
    h3 = num_outputs * 10
    h2 = int(np.sqrt(h1 * h3))
    rng = np.random.RandomState(seed)

    sizes = [(num_inputs, h1), (h1, h2), (h2, h3), (h3, num_outputs)]
    stds = [np.sqrt(2), np.sqrt(2), np.sqrt(2), 0.01]

    params = {}
    for k, ((fin, fout), std) in enumerate(zip(sizes, stds)):
        w_torch = _orthogonal(rng, fout, fin, std)          # [fout, fin]
        params[f"w{k + 1}"] = jnp.asarray(w_torch.T)        # [fin, fout]
        params[f"b{k + 1}"] = jnp.zeros((1, fout), jnp.float32)
    params["logstd"] = jnp.zeros((1, num_outputs), jnp.float32)
    return params, (h1, h2, h3)


def pad_params_for_kernel(params):
    """Zero-pad every weight/bias feature dim up to a multiple of 128 lanes.

    Zero rows/cols + zero bias columns mean padded activations are exactly
    tanh(0) = 0, so the final slice mu[:, :num_outputs] is exact.
    """
    padded = {}
    for k in range(1, 5):
        w = params[f"w{k}"]
        b = params[f"b{k}"]
        fin, fout = w.shape
        p_in = _round_up(fin, _LANE)
        p_out = _round_up(fout, _LANE)
        padded[f"w{k}"] = jnp.pad(w, ((0, p_in - fin), (0, p_out - fout)))
        padded[f"b{k}"] = jnp.pad(b, ((0, 0), (0, p_out - fout)))
    padded["logstd"] = params["logstd"]           # kept unpadded (x-independent)
    return padded


# ------------------------------------------------------------------
# Pallas kernel: fused 4x (Linear -> Tanh) producing mu for one batch tile.
# All feature dims are 128-lane padded; std is handled in the wrapper.
# ------------------------------------------------------------------
def grpo_agent_kernel(x_ref,
                      w1_ref, b1_ref,
                      w2_ref, b2_ref,
                      w3_ref, b3_ref,
                      w4_ref, b4_ref,
                      mu_ref):
    x = x_ref[...]

    h = jnp.tanh(jnp.dot(x, w1_ref[...], preferred_element_type=jnp.float32)
                 + b1_ref[...])
    h = jnp.tanh(jnp.dot(h, w2_ref[...], preferred_element_type=jnp.float32)
                 + b2_ref[...])
    h = jnp.tanh(jnp.dot(h, w3_ref[...], preferred_element_type=jnp.float32)
                 + b3_ref[...])
    mu = jnp.tanh(jnp.dot(h, w4_ref[...], preferred_element_type=jnp.float32)
                  + b4_ref[...])

    mu_ref[...] = mu.astype(mu_ref.dtype)


def grpo_agent_forward(x, pparams, block_b=2048):
    """Returns (mu, std) matching GRPOAgent.forward.

    `pparams` must be the 128-lane-padded params from pad_params_for_kernel.
    """
    B, nin = x.shape
    P_in = pparams["w1"].shape[0]
    P_h1 = pparams["w1"].shape[1]
    P_h2 = pparams["w2"].shape[1]
    P_h3 = pparams["w3"].shape[1]
    P_out = pparams["w4"].shape[1]
    A = pparams["logstd"].shape[1]               # logical num_outputs

    # Lane-dense input: pad feature dim up to P_in (zero cols * zero W rows = 0).
    if nin != P_in:
        x = jnp.pad(x, ((0, 0), (0, P_in - nin)))

    # Batch tile: one big tile when it fits (per-grid-step overhead dominates
    # this tiny MLP); multiple of 8 sublanes either way.
    bb = min(_round_up(max(B, _SUBLANE), _SUBLANE), _round_up(block_b, _SUBLANE))
    n_tiles = pl.cdiv(B, bb)
    B_pad = n_tiles * bb
    if B_pad != B:
        x = jnp.pad(x, ((0, B_pad - B), (0, 0)))

    # Full-array constant blocks for weights/biases: VMEM-resident across tiles.
    def const_spec(arr):
        return pl.BlockSpec(arr.shape, lambda i: (0, 0))

    weight_bytes = 4 * sum(int(np.prod(pparams[k].shape))
                           for k in ("w1", "b1", "w2", "b2",
                                     "w3", "b3", "w4", "b4"))
    macs_per_row = P_in * P_h1 + P_h1 * P_h2 + P_h2 * P_h3 + P_h3 * P_out
    cost = pl.CostEstimate(
        flops=2 * B_pad * macs_per_row,
        transcendentals=B_pad * (P_h1 + P_h2 + P_h3 + P_out),
        bytes_accessed=4 * B_pad * (P_in + P_out) + weight_bytes,
    )

    dim_sem = ("parallel",) if n_tiles >= 2 else ("arbitrary",)

    mu = pl.pallas_call(
        grpo_agent_kernel,
        out_shape=jax.ShapeDtypeStruct((B_pad, P_out), jnp.float32),
        grid=(n_tiles,),
        in_specs=[
            pl.BlockSpec((bb, P_in), lambda i: (i, 0)),        # x tile
            const_spec(pparams["w1"]), const_spec(pparams["b1"]),
            const_spec(pparams["w2"]), const_spec(pparams["b2"]),
            const_spec(pparams["w3"]), const_spec(pparams["b3"]),
            const_spec(pparams["w4"]), const_spec(pparams["b4"]),
        ],
        out_specs=pl.BlockSpec((bb, P_out), lambda i: (i, 0)),  # lane-dense store
        compiler_params=pltpu.CompilerParams(dimension_semantics=dim_sem),
        cost_estimate=cost,
    )(x,
      pparams["w1"], pparams["b1"],
      pparams["w2"], pparams["b2"],
      pparams["w3"], pparams["b3"],
      pparams["w4"], pparams["b4"])

    mu = mu[:B, :A]

    # std is independent of x: compute once in plain JAX, broadcast to mu.shape
    # to match GRPOAgent.forward's expand_as semantics.
    std = jnp.exp(jnp.clip(pparams["logstd"], LOGSTD_MIN, LOGSTD_MAX))
    std = jnp.broadcast_to(std, mu.shape)
    return mu, std


# ------------------------------------------------------------------
# Reference (plain JAX, unpadded params) for sanity checking
# ------------------------------------------------------------------
def grpo_agent_reference(x, params):
    h = jnp.tanh(x @ params["w1"] + params["b1"])
    h = jnp.tanh(h @ params["w2"] + params["b2"])
    h = jnp.tanh(h @ params["w3"] + params["b3"])
    mu = jnp.tanh(h @ params["w4"] + params["b4"])
    std = jnp.exp(jnp.clip(params["logstd"], LOGSTD_MIN, LOGSTD_MAX))
    return mu, jnp.broadcast_to(std, mu.shape)


if __name__ == "__main__":
    num_inputs, num_outputs = 8, 4     # -> hidden sizes 80, 56, 40
    batch = 64                         # small rollout batch

    params, hidden_sizes = make_params(num_inputs, num_outputs, seed=0)
    pparams = pad_params_for_kernel(params)

    key = jax.random.PRNGKey(0)
    x = jax.random.normal(key, (batch, num_inputs), dtype=jnp.float32)

    mu, std = grpo_agent_forward(x, pparams)
    mu, std = jax.block_until_ready((mu, std))

    mu_ref, std_ref = grpo_agent_reference(x, params)
    assert mu.shape == (batch, num_outputs)
    assert std.shape == (batch, num_outputs)
    np.testing.assert_allclose(np.asarray(mu), np.asarray(mu_ref),
                               rtol=1e-5, atol=1e-5)
    np.testing.assert_allclose(np.asarray(std), np.asarray(std_ref),
                               rtol=1e-6, atol=1e-6)

    # Also check a batch that is NOT a multiple of 8 (padding path) and a
    # multi-tile batch (grid > 1, megacore path).
    x2 = jax.random.normal(jax.random.PRNGKey(1), (37, num_inputs), jnp.float32)
    mu2, std2 = jax.block_until_ready(grpo_agent_forward(x2, pparams))
    mu2_ref, std2_ref = grpo_agent_reference(x2, params)
    np.testing.assert_allclose(np.asarray(mu2), np.asarray(mu2_ref),
                               rtol=1e-5, atol=1e-5)
    np.testing.assert_allclose(np.asarray(std2), np.asarray(std2_ref),
                               rtol=1e-6, atol=1e-6)

    x3 = jax.random.normal(jax.random.PRNGKey(2), (300, num_inputs), jnp.float32)
    mu3, _ = jax.block_until_ready(grpo_agent_forward(x3, pparams, block_b=128))
    mu3_ref, _ = grpo_agent_reference(x3, params)
    np.testing.assert_allclose(np.asarray(mu3), np.asarray(mu3_ref),
                               rtol=1e-5, atol=1e-5)

    print("KERNEL_OK")
</pallas_src>

<mosaic_0001>
module attributes {stable_mosaic.version = 11 : i64} {
  func.func @grpo_agent_kernel(%arg0: i32, %arg1: memref<64x128xf32, #tpu.memory_space<vmem>>, %arg2: memref<128x128xf32, #tpu.memory_space<vmem>>, %arg3: memref<1x128xf32, #tpu.memory_space<vmem>>, %arg4: memref<128x128xf32, #tpu.memory_space<vmem>>, %arg5: memref<1x128xf32, #tpu.memory_space<vmem>>, %arg6: memref<128x128xf32, #tpu.memory_space<vmem>>, %arg7: memref<1x128xf32, #tpu.memory_space<vmem>>, %arg8: memref<128x128xf32, #tpu.memory_space<vmem>>, %arg9: memref<1x128xf32, #tpu.memory_space<vmem>>, %arg10: memref<64x128xf32, #tpu.memory_space<vmem>>) attributes {dimension_semantics = [#tpu.dimension_semantics<arbitrary>], iteration_bounds = array<i64: 1>, scalar_prefetch = 0 : i64, scratch_operands = 0 : i64, tpu.core_type = #tpu.core_type<tc>, window_params = [{transform_indices = @transform_0, window_bounds = array<i64: 64, 128>}, {pipeline_mode = #tpu.pipeline_mode<synchronous>, transform_indices = @transform_1, window_bounds = array<i64: 128, 128>}, {pipeline_mode = #tpu.pipeline_mode<synchronous>, transform_indices = @transform_2, window_bounds = array<i64: 1, 128>}, {pipeline_mode = #tpu.pipeline_mode<synchronous>, transform_indices = @transform_3, window_bounds = array<i64: 128, 128>}, {pipeline_mode = #tpu.pipeline_mode<synchronous>, transform_indices = @transform_4, window_bounds = array<i64: 1, 128>}, {pipeline_mode = #tpu.pipeline_mode<synchronous>, transform_indices = @transform_5, window_bounds = array<i64: 128, 128>}, {pipeline_mode = #tpu.pipeline_mode<synchronous>, transform_indices = @transform_6, window_bounds = array<i64: 1, 128>}, {pipeline_mode = #tpu.pipeline_mode<synchronous>, transform_indices = @transform_7, window_bounds = array<i64: 128, 128>}, {pipeline_mode = #tpu.pipeline_mode<synchronous>, transform_indices = @transform_8, window_bounds = array<i64: 1, 128>}, {transform_indices = @transform_9, window_bounds = array<i64: 64, 128>}]} {
    %c0 = arith.constant 0 : index
    %c0_0 = arith.constant 0 : index
    %0 = vector.load %arg1[%c0, %c0_0] : memref<64x128xf32, #tpu.memory_space<vmem>>, vector<64x128xf32>
    %c0_1 = arith.constant 0 : index
    %c0_2 = arith.constant 0 : index
    %1 = vector.load %arg2[%c0_1, %c0_2] : memref<128x128xf32, #tpu.memory_space<vmem>>, vector<128x128xf32>
    %cst = arith.constant dense<0.000000e+00> : vector<64x128xf32>
    %2 = tpu.matmul %0, %1, %cst {dimension_numbers = #tpu.dot_dimension_numbers<[1], [0], [0], [1], [0, 0, 1, 1], [], []>} : vector<64x128xf32>, vector<128x128xf32>, vector<64x128xf32> -> vector<64x128xf32>
    %c0_3 = arith.constant 0 : index
    %c0_4 = arith.constant 0 : index
    %3 = vector.load %arg3[%c0_3, %c0_4] : memref<1x128xf32, #tpu.memory_space<vmem>>, vector<1x128xf32>
    %4 = vector.broadcast %3 : vector<1x128xf32> to vector<64x128xf32>
    %5 = arith.addf %2, %4 : vector<64x128xf32>
    %6 = math.tanh %5 : vector<64x128xf32>
    %c0_5 = arith.constant 0 : index
    %c0_6 = arith.constant 0 : index
    %7 = vector.load %arg4[%c0_5, %c0_6] : memref<128x128xf32, #tpu.memory_space<vmem>>, vector<128x128xf32>
    %cst_7 = arith.constant dense<0.000000e+00> : vector<64x128xf32>
    %8 = tpu.matmul %6, %7, %cst_7 {dimension_numbers = #tpu.dot_dimension_numbers<[1], [0], [0], [1], [0, 0, 1, 1], [], []>} : vector<64x128xf32>, vector<128x128xf32>, vector<64x128xf32> -> vector<64x128xf32>
    %c0_8 = arith.constant 0 : index
    %c0_9 = arith.constant 0 : index
    %9 = vector.load %arg5[%c0_8, %c0_9] : memref<1x128xf32, #tpu.memory_space<vmem>>, vector<1x128xf32>
    %10 = vector.broadcast %9 : vector<1x128xf32> to vector<64x128xf32>
    %11 = arith.addf %8, %10 : vector<64x128xf32>
    %12 = math.tanh %11 : vector<64x128xf32>
    %c0_10 = arith.constant 0 : index
    %c0_11 = arith.constant 0 : index
    %13 = vector.load %arg6[%c0_10, %c0_11] : memref<128x128xf32, #tpu.memory_space<vmem>>, vector<128x128xf32>
    %cst_12 = arith.constant dense<0.000000e+00> : vector<64x128xf32>
    %14 = tpu.matmul %12, %13, %cst_12 {dimension_numbers = #tpu.dot_dimension_numbers<[1], [0], [0], [1], [0, 0, 1, 1], [], []>} : vector<64x128xf32>, vector<128x128xf32>, vector<64x128xf32> -> vector<64x128xf32>
    %c0_13 = arith.constant 0 : index
    %c0_14 = arith.constant 0 : index
    %15 = vector.load %arg7[%c0_13, %c0_14] : memref<1x128xf32, #tpu.memory_space<vmem>>, vector<1x128xf32>
    %16 = vector.broadcast %15 : vector<1x128xf32> to vector<64x128xf32>
    %17 = arith.addf %14, %16 : vector<64x128xf32>
    %18 = math.tanh %17 : vector<64x128xf32>
    %c0_15 = arith.constant 0 : index
    %c0_16 = arith.constant 0 : index
    %19 = vector.load %arg8[%c0_15, %c0_16] : memref<128x128xf32, #tpu.memory_space<vmem>>, vector<128x128xf32>
    %cst_17 = arith.constant dense<0.000000e+00> : vector<64x128xf32>
    %20 = tpu.matmul %18, %19, %cst_17 {dimension_numbers = #tpu.dot_dimension_numbers<[1], [0], [0], [1], [0, 0, 1, 1], [], []>} : vector<64x128xf32>, vector<128x128xf32>, vector<64x128xf32> -> vector<64x128xf32>
    %c0_18 = arith.constant 0 : index
    %c0_19 = arith.constant 0 : index
    %21 = vector.load %arg9[%c0_18, %c0_19] : memref<1x128xf32, #tpu.memory_space<vmem>>, vector<1x128xf32>
    %22 = vector.broadcast %21 : vector<1x128xf32> to vector<64x128xf32>
    %23 = arith.addf %20, %22 : vector<64x128xf32>
    %24 = math.tanh %23 : vector<64x128xf32>
    %c0_20 = arith.constant 0 : index
    %c0_21 = arith.constant 0 : index
    %25 = vector.load %arg10[%c0_20, %c0_21] : memref<64x128xf32, #tpu.memory_space<vmem>>, vector<64x128xf32>
    tpu.vector_store %arg10[%c0_20, %c0_21], %24 {strides = array<i32>} : memref<64x128xf32, #tpu.memory_space<vmem>>, vector<64x128xf32>,
    return
  }
  func.func @transform_0(%arg0: i32) -> (i32, i32) {
    %c0_i32 = arith.constant 0 : i32
    %c0_i32_0 = arith.constant 0 : i32
    return %arg0, %c0_i32 : i32, i32
  }
  func.func @transform_1(%arg0: i32) -> (i32, i32) {
    %c0_i32 = arith.constant 0 : i32
    %c0_i32_0 = arith.constant 0 : i32
    %c0_i32_1 = arith.constant 0 : i32
    return %c0_i32, %c0_i32_0 : i32, i32
  }
  func.func @transform_2(%arg0: i32) -> (i32, i32) {
    %c0_i32 = arith.constant 0 : i32
    %c0_i32_0 = arith.constant 0 : i32
    %c0_i32_1 = arith.constant 0 : i32
    return %c0_i32, %c0_i32_0 : i32, i32
  }
  func.func @transform_3(%arg0: i32) -> (i32, i32) {
    %c0_i32 = arith.constant 0 : i32
    %c0_i32_0 = arith.constant 0 : i32
    %c0_i32_1 = arith.constant 0 : i32
    return %c0_i32, %c0_i32_0 : i32, i32
  }
  func.func @transform_4(%arg0: i32) -> (i32, i32) {
    %c0_i32 = arith.constant 0 : i32
    %c0_i32_0 = arith.constant 0 : i32
    %c0_i32_1 = arith.constant 0 : i32
    return %c0_i32, %c0_i32_0 : i32, i32
  }
  func.func @transform_5(%arg0: i32) -> (i32, i32) {
    %c0_i32 = arith.constant 0 : i32
    %c0_i32_0 = arith.constant 0 : i32
    %c0_i32_1 = arith.constant 0 : i32
    return %c0_i32, %c0_i32_0 : i32, i32
  }
  func.func @transform_6(%arg0: i32) -> (i32, i32) {
    %c0_i32 = arith.constant 0 : i32
    %c0_i32_0 = arith.constant 0 : i32
    %c0_i32_1 = arith.constant 0 : i32
    return %c0_i32, %c0_i32_0 : i32, i32
  }
  func.func @transform_7(%arg0: i32) -> (i32, i32) {
    %c0_i32 = arith.constant 0 : i32
    %c0_i32_0 = arith.constant 0 : i32
    %c0_i32_1 = arith.constant 0 : i32
    return %c0_i32, %c0_i32_0 : i32, i32
  }
  func.func @transform_8(%arg0: i32) -> (i32, i32) {
    %c0_i32 = arith.constant 0 : i32
    %c0_i32_0 = arith.constant 0 : i32
    %c0_i32_1 = arith.constant 0 : i32
    return %c0_i32, %c0_i32_0 : i32, i32
  }
  func.func @transform_9(%arg0: i32) -> (i32, i32) {
    %c0_i32 = arith.constant 0 : i32
    %c0_i32_0 = arith.constant 0 : i32
    return %arg0, %c0_i32 : i32, i32
  }
}

</mosaic_0001>

<bundles_post_ra>
// kernel: tpu_custom_call.1
= control target key start
LH: loop header
LB: loop body
LE: loop exit
PB: predicated region body
PF: predicated region fallthrough
CT: control target
= control target key end

     0   :  { %14 = vsyncpa [#allocation3], 0  ;;  %s1262_s0 = inlined_call_operand.hbm [shape: f32[64,128], index: 0, kind: input, shape index: {}]   ;;  %s1263_s1 = inlined_call_operand.hbm [shape: f32[128,128], index: 1, kind: input, shape index: {}]   ;;  %s1264_s2 = inlined_call_operand.vmem [shape: f32[1,128], index: 2, kind: input, shape index: {}]   ;;  %s1265_s3 = inlined_call_operand.hbm [shape: f32[128,128], index: 3, kind: input, shape index: {}]   ;;  %s1266_s4 = inlined_call_operand.vmem [shape: f32[1,128], index: 4, kind: input, shape index: {}]   ;;  %s1267_s5 = inlined_call_operand.hbm [shape: f32[128,128], index: 5, kind: input, shape index: {}]   ;;  %s1268_s6 = inlined_call_operand.vmem [shape: f32[1,128], index: 6, kind: input, shape index: {}]   ;;  %s1269_s7 = inlined_call_operand.hbm [shape: f32[128,128], index: 7, kind: input, shape index: {}]   ;;  %s1270_s8 = inlined_call_operand.vmem [shape: f32[1,128], index: 8, kind: input, shape index: {}]   ;;  %s1271_s9 = inlined_call_operand.hbm [shape: f32[64,128], index: 9, kind: output, shape index: {}]  }
   0x1   :  { %15 = vsyncpa [#allocation6], 0 }
   0x2   :  { %16 = vsyncpa [#allocation9], 0 }
   0x3   :  { %17 = vsyncpa [#allocation4], 0  ;;  %s1156_s30 = smov [#allocation5]   ;;  %s1157_s11 = smov [#allocation8]  }
   0x4   :  { %s35_s10 = sshll.u32 %s1156_s30, 4  ;;  %s63_s12 = sshll.u32 %s1157_s11, 4  ;;  %s36_s10 = int_to_ptr.vmem [resolvable:$true] %s35_s10  ;;  %s64_s12 = int_to_ptr.vmem [resolvable:$true] %s63_s12 }
   0x5   :  { %s1036_s13 = scalar_lea.vmem %s36_s10, 2048  ;;  %p1041_p1 = scmp.lt.s32.totalorder %s36_s10, %s36_s10 }
   0x6   :  { %p1037_p0 = scmp.ne.s32.totalorder %s36_s10, %s1036_s13  ;;  %p1042_p2 = scmp.lt.s32.totalorder %s1036_s13, %s1036_s13 }
   0x8   :  { %p1043_p3 = por %p1042_p2, %p1041_p1 }
   0xa   :  { %p1044_p4 = pnand %p1043_p3, %p1037_p0 }
   0xc   :  { %1047 = shalt.err (!%p1044_p4)
}
   0xd   :  { %s1158_s14 = smov 128   ;;  %s1159_s15 = smov 8  }
   0xe   :  { %41 = dma.hbm_to_vmem [thread:$0]  %s1263_s1, 2048, %s36_s10, [#allocation6], %s1158_s14, %s1158_s14, %s1159_s15  }
   0xf   :  { %s1056_s18 = scalar_lea.vmem %s64_s12, 2048  ;;  %p1061_p6 = scmp.lt.s32.totalorder %s64_s12, %s64_s12 }
  0x10   :  { %p1057_p5 = scmp.ne.s32.totalorder %s64_s12, %s1056_s18  ;;  %p1062_p7 = scmp.lt.s32.totalorder %s1056_s18, %s1056_s18 }
  0x12   :  { %p1063_p8 = por %p1062_p7, %p1061_p6 }
  0x14   :  { %p1064_p9 = pnand %p1063_p8, %p1057_p5 }
  0x16   :  { %1067 = shalt.err (!%p1064_p9)
}
  0x17   :  { %69 = dma.hbm_to_vmem [thread:$0]  %s1267_s5, 2048, %s64_s12, [#allocation9], %s1158_s14, %s1158_s14, %s1159_s15  }
  0x18   :  { %s1160_s21 = smov [#allocation2]   ;;  %s1161_s23 = smov [#allocation7]  }
  0x19   :  { %s23_s22 = sshll.u32 %s1160_s21, 4  ;;  %s49_s24 = sshll.u32 %s1161_s23, 4  ;;  %s24_s22 = int_to_ptr.vmem [resolvable:$true] %s23_s22  ;;  %s50_s24 = int_to_ptr.vmem [resolvable:$true] %s49_s24 }
  0x1a   :  { %s1076_s1 = scalar_lea.vmem %s24_s22, 1024  ;;  %p1081_p11 = scmp.lt.s32.totalorder %s24_s22, %s24_s22 }
  0x1b   :  { %p1077_p10 = scmp.ne.s32.totalorder %s24_s22, %s1076_s1  ;;  %p1082_p12 = scmp.lt.s32.totalorder %s1076_s1, %s1076_s1 }
  0x1d   :  { %p1083_p13 = por %p1082_p12, %p1081_p11 }
  0x1f   :  { %p1084_p0 = pnand %p1083_p13, %p1077_p10 }
  0x21   :  { %1087 = shalt.err (!%p1084_p0)
}
  0x22   :  { %29 = dma.hbm_to_vmem [thread:$0]  %s1262_s0, 1024, %s24_s22, [#allocation3], %s1158_s14, %s1158_s14, %s1159_s15  }
  0x23   :  { %s1096_s5 = scalar_lea.vmem %s50_s24, 2048  ;;  %p1101_p2 = scmp.lt.s32.totalorder %s50_s24, %s50_s24 }
  0x24   :  { %p1097_p1 = scmp.ne.s32.totalorder %s50_s24, %s1096_s5  ;;  %p1102_p3 = scmp.lt.s32.totalorder %s1096_s5, %s1096_s5 }
  0x26   :  { %p1103_p4 = por %p1102_p3, %p1101_p2 }
  0x28   :  { %p1104_p5 = pnand %p1103_p4, %p1097_p1 }
  0x2a   :  { %1107 = shalt.err (!%p1104_p5)
}
  0x2b   :  { %55 = dma.hbm_to_vmem [thread:$0]  %s1265_s3, 2048, %s50_s24, [#allocation6], %s1158_s14, %s1158_s14, %s1159_s15  }
  0x2c   :  { %s1162_s29 = smov [#allocation10]  }
  0x2d   :  { %s77_s30 = sshll.u32 %s1162_s29, 4  ;;  %s78_s30 = int_to_ptr.vmem [resolvable:$true] %s77_s30 }
  0x2e   :  { %s1116_s10 = scalar_lea.vmem %s78_s30, 2048  ;;  %p1121_p7 = scmp.lt.s32.totalorder %s78_s30, %s78_s30 }
  0x2f   :  { %p1117_p6 = scmp.ne.s32.totalorder %s78_s30, %s1116_s10  ;;  %p1122_p8 = scmp.lt.s32.totalorder %s1116_s10, %s1116_s10 }
  0x31   :  { %p1123_p9 = por %p1122_p8, %p1121_p7 }
  0x33   :  { %p1124_p10 = pnand %p1123_p9, %p1117_p6 }
  0x35   :  { %1127 = shalt.err (!%p1124_p10)
}
  0x36   :  { %83 = dma.hbm_to_vmem [thread:$0]  %s1269_s7, 2048, %s78_s30, [#allocation9], %s1158_s14, %s1158_s14, %s1159_s15  }
  0x37   :  { %1148 = dma.done.wait [#allocation3], 1024  }
  0x38   :  { %1149 = vsyncadd [#allocation3], 4294966272 }
  0x39   :  { %1150 = dma.done.wait [#allocation6], 4096  }
  0x3a   :  { %1151 = vsyncadd [#allocation6], 4294963200 }
  0x3b   :  { %1152 = dma.done.wait [#allocation9], 4096  }
  0x3c   :  { %1153 = vsyncadd [#allocation9], 4294963200  ;;  %v124_v0 = vld [vmem:[#allocation5 + $0x78] sm:$0xff]  ;;  %v123_v1 = vld [vmem:[#allocation5 + $0x70] sm:$0xff] }
  0x3d   :  { %780 = vmatprep.subr.mxu0 %v124_v0  ;;  %v122_v2 = vld [vmem:[#allocation5 + $0x68] sm:$0xff]  ;;  %v121_v3 = vld [vmem:[#allocation5 + $0x60] sm:$0xff]  ;;  %v120_v5 = vld [vmem:[#allocation5 + $0x58] sm:$0xff] }
  0x3e   :  { %781 = vmatpush3.msra.mxu0 %v124_v0  ;;  %v101_v4 = vld [vmem:[#allocation2] sm:$0xff]  ;;  %v119_v6 = vld [vmem:[#allocation5 + $0x50] sm:$0xff]  ;;  %v260_v7 = vld [vmem:[#allocation7 + $0x78] sm:$0xff] }
  0x3f   :  { %782 = vmatprep.subr.mxu0 %v123_v1  ;;  %812 = vmatprep.mubr.f32.mxu0 %v101_v4  ;;  %v259_v8 = vld [vmem:[#allocation7 + $0x70] sm:$0xff]  ;;  %v118_v9 = vld [vmem:[#allocation5 + $0x48] sm:$0xff]  ;;  %v117_v11 = vld [vmem:[#allocation5 + $0x40] sm:$0xff] }
  0x40   :  { %783 = vmatpush3.msra.mxu0 %v123_v1  ;;  %824 = vmatprep.subr.mxu1 %v260_v7  ;;  %v258_v10 = vld [vmem:[#allocation7 + $0x68] sm:$0xff]  ;;  %v257_v12 = vld [vmem:[#allocation7 + $0x60] sm:$0xff]  ;;  %v116_v13 = vld [vmem:[#allocation5 + $0x38] sm:$0xff] }
  0x41   :  { %784 = vmatprep.subr.mxu0 %v122_v2  ;;  %825 = vmatpush3.msra.mxu1 %v260_v7  ;;  %v256_v14 = vld [vmem:[#allocation7 + $0x58] sm:$0xff]  ;;  %v115_v15 = vld [vmem:[#allocation5 + $0x30] sm:$0xff]  ;;  %v114_v17 = vld [vmem:[#allocation5 + $0x28] sm:$0xff] }
  0x42   :  { %785 = vmatpush3.msra.mxu0 %v122_v2  ;;  %826 = vmatprep.subr.mxu1 %v259_v8  ;;  %v255_v16 = vld [vmem:[#allocation7 + $0x50] sm:$0xff]  ;;  %v113_v18 = vld [vmem:[#allocation5 + $0x20] sm:$0xff]  ;;  %v112_v19 = vld [vmem:[#allocation5 + $0x18] sm:$0xff] }
  0x43   :  { %786 = vmatprep.subr.mxu0 %v121_v3  ;;  %827 = vmatpush3.msra.mxu1 %v259_v8  ;;  %v111_v20 = vld [vmem:[#allocation5 + $0x10] sm:$0xff]  ;;  %v110_v21 = vld [vmem:[#allocation5 + $0x8] sm:$0xff]  ;;  %v109_v22 = vld [vmem:[#allocation5] sm:$0xff] }
  0x44   :  { %787 = vmatpush3.msra.mxu0 %v121_v3  ;;  %828 = vmatprep.subr.mxu1 %v258_v10  ;;  %v102_v23 = vld [vmem:[#allocation2 + $0x8] sm:$0xff]  ;;  %v103_v24 = vld [vmem:[#allocation2 + $0x10] sm:$0xff]  ;;  %v104_v25 = vld [vmem:[#allocation2 + $0x18] sm:$0xff] }
  0x45   :  { %788 = vmatprep.subr.mxu0 %v120_v5  ;;  %829 = vmatpush3.msra.mxu1 %v258_v10  ;;  %v105_v26 = vld [vmem:[#allocation2 + $0x20] sm:$0xff]  ;;  %v106_v27 = vld [vmem:[#allocation2 + $0x28] sm:$0xff]  ;;  %v107_v28 = vld [vmem:[#allocation2 + $0x30] sm:$0xff] }
  0x46   :  { %789 = vmatpush3.msra.mxu0 %v120_v5  ;;  %830 = vmatprep.subr.mxu1 %v257_v12  ;;  %v108_v29 = vld [vmem:[#allocation2 + $0x38] sm:$0xff]  ;;  %v254_v30 = vld [vmem:[#allocation7 + $0x48] sm:$0xff]  ;;  %v253_v31 = vld [vmem:[#allocation7 + $0x40] sm:$0xff] }
  0x47   :  { %790 = vmatprep.subr.mxu0 %v119_v6  ;;  %831 = vmatpush3.msra.mxu1 %v257_v12  ;;  %v252_v32 = vld [vmem:[#allocation7 + $0x38] sm:$0xff]  ;;  %v251_v33 = vld [vmem:[#allocation7 + $0x30] sm:$0xff]  ;;  %v250_v34 = vld [vmem:[#allocation7 + $0x28] sm:$0xff] }
  0x48   :  { %791 = vmatpush3.msra.mxu0 %v119_v6  ;;  %832 = vmatprep.subr.mxu1 %v256_v14  ;;  %v249_v35 = vld [vmem:[#allocation7 + $0x20] sm:$0xff]  ;;  %v248_v36 = vld [vmem:[#allocation7 + $0x18] sm:$0xff]  ;;  %v247_v37 = vld [vmem:[#allocation7 + $0x10] sm:$0xff] }
  0x49   :  { %792 = vmatprep.subr.mxu0 %v118_v9  ;;  %833 = vmatpush3.msra.mxu1 %v256_v14  ;;  %v246_v38 = vld [vmem:[#allocation7 + $0x8] sm:$0xff]  ;;  %v245_v39 = vld [vmem:[#allocation7] sm:$0xff]  ;;  %v396_v40 = vld [vmem:[#allocation8 + $0x78] sm:$0xff] }
  0x4a   :  { %793 = vmatpush3.msra.mxu0 %v118_v9  ;;  %834 = vmatprep.subr.mxu1 %v255_v16  ;;  %v395_v41 = vld [vmem:[#allocation8 + $0x70] sm:$0xff]  ;;  %v394_v42 = vld [vmem:[#allocation8 + $0x68] sm:$0xff]  ;;  %v393_v43 = vld [vmem:[#allocation8 + $0x60] sm:$0xff] }
  0x4b   :  { %794 = vmatprep.subr.mxu0 %v117_v11  ;;  %835 = vmatpush3.msra.mxu1 %v255_v16  ;;  %v392_v44 = vld [vmem:[#allocation8 + $0x58] sm:$0xff]  ;;  %v391_v45 = vld [vmem:[#allocation8 + $0x50] sm:$0xff]  ;;  %v680_v46 = vld [vmem:[%s1264_s2] ss:$0 sm:$0xff] }
  0x4c   :  { %795 = vmatpush3.msra.mxu0 %v117_v11  ;;  %836 = vmatprep.subr.mxu1 %v254_v30  ;;  %v390_v7 = vld [vmem:[#allocation8 + $0x48] sm:$0xff]  ;;  %v389_v8 = vld [vmem:[#allocation8 + $0x40] sm:$0xff]  ;;  %v388_v9 = vld [vmem:[#allocation8 + $0x38] sm:$0xff] }
  0x4d   :  { %796 = vmatprep.subr.mxu0 %v116_v13  ;;  %837 = vmatpush3.msra.mxu1 %v254_v30  ;;  %v387_v10 = vld [vmem:[#allocation8 + $0x30] sm:$0xff]  ;;  %v386_v11 = vld [vmem:[#allocation8 + $0x28] sm:$0xff]  ;;  %v385_v12 = vld [vmem:[#allocation8 + $0x20] sm:$0xff] }
  0x4e   :  { %797 = vmatpush3.msra.mxu0 %v116_v13  ;;  %838 = vmatprep.subr.mxu1 %v253_v31  ;;  %v384_v13 = vld [vmem:[#allocation8 + $0x18] sm:$0xff]  ;;  %v383_v14 = vld [vmem:[#allocation8 + $0x10] sm:$0xff]  ;;  %v381_v16 = vld [vmem:[#allocation8] sm:$0xff] }
  0x4f   :  { %798 = vmatprep.subr.mxu0 %v115_v15  ;;  %839 = vmatpush3.msra.mxu1 %v253_v31 }
  0x50   :  { %799 = vmatpush3.msra.mxu0 %v115_v15  ;;  %840 = vmatprep.subr.mxu1 %v252_v32  ;;  %v382_v15 = vld [vmem:[#allocation8 + $0x8] sm:$0xff] }
  0x51   :  { %800 = vmatprep.subr.mxu0 %v114_v17  ;;  %841 = vmatpush3.msra.mxu1 %v252_v32 }
  0x52   :  { %801 = vmatpush3.msra.mxu0 %v114_v17  ;;  %842 = vmatprep.subr.mxu1 %v251_v33  ;;  %v532_v17 = vld [vmem:[#allocation10 + $0x78] sm:$0xff] }
  0x53   :  { %802 = vmatprep.subr.mxu0 %v113_v18  ;;  %843 = vmatpush3.msra.mxu1 %v251_v33 }
  0x54   :  { %803 = vmatpush3.msra.mxu0 %v113_v18  ;;  %844 = vmatprep.subr.mxu1 %v250_v34  ;;  %v531_v18 = vld [vmem:[#allocation10 + $0x70] sm:$0xff] }
  0x55   :  { %804 = vmatprep.subr.mxu0 %v112_v19  ;;  %845 = vmatpush3.msra.mxu1 %v250_v34 }
  0x56   :  { %805 = vmatpush3.msra.mxu0 %v112_v19  ;;  %846 = vmatprep.subr.mxu1 %v249_v35  ;;  %v530_v19 = vld [vmem:[#allocation10 + $0x68] sm:$0xff] }
  0x57   :  { %806 = vmatprep.subr.mxu0 %v111_v20  ;;  %847 = vmatpush3.msra.mxu1 %v249_v35 }
  0x58   :  { %807 = vmatpush3.msra.mxu0 %v111_v20  ;;  %848 = vmatprep.subr.mxu1 %v248_v36  ;;  %v529_v20 = vld [vmem:[#allocation10 + $0x60] sm:$0xff] }
  0x59   :  { %808 = vmatprep.subr.mxu0 %v110_v21  ;;  %849 = vmatpush3.msra.mxu1 %v248_v36 }
  0x5a   :  { %809 = vmatpush3.msra.mxu0 %v110_v21  ;;  %850 = vmatprep.subr.mxu1 %v247_v37  ;;  %v528_v21 = vld [vmem:[#allocation10 + $0x58] sm:$0xff] }
  0x5b   :  { %810 = vmatprep.subr.mxu0 %v109_v22  ;;  %851 = vmatpush3.msra.mxu1 %v247_v37 }
  0x5c   :  { %811 = vmatpush3.msra.mxu0 %v109_v22  ;;  %852 = vmatprep.subr.mxu1 %v246_v38  ;;  %v527_v22 = vld [vmem:[#allocation10 + $0x50] sm:$0xff] }
  0x5d   :  { %813 = vmatmul.mubr.f32.vlgmr.msra.gmra.mxu0 %v102_v23  ;;  %853 = vmatpush3.msra.mxu1 %v246_v38  ;;  %v681_v23 = vld [vmem:[%s1266_s4] ss:$0 sm:$0xff] }
  0x5e   :  { %815 = vmatprep.mubr.f32.mxu0 %v103_v24  ;;  %854 = vmatprep.subr.mxu1 %v245_v39 }
  0x5f   :  { %855 = vmatpush3.msra.mxu1 %v245_v39  ;;  %868 = vmatprep.subr.mxu0 %v396_v40 }
  0x60   :  { %869 = vmatpush3.msra.mxu0 %v396_v40  ;;  %912 = vmatprep.subr.mxu1 %v532_v17 }
  0x61   :  { %816 = vmatmul.mubr.f32.gmra.mxu0 %v104_v25  ;;  %870 = vmatprep.subr.mxu0 %v395_v41 }
  0x62   :  { %818 = vmatprep.mubr.f32.mxu0 %v105_v26  ;;  %871 = vmatpush3.msra.mxu0 %v395_v41 }
  0x63   :  { %872 = vmatprep.subr.mxu0 %v394_v42 }
  0x64   :  { %873 = vmatpush3.msra.mxu0 %v394_v42 }
  0x65   :  { %819 = vmatmul.mubr.f32.gmra.mxu0 %v106_v27  ;;  %874 = vmatprep.subr.mxu0 %v393_v43 }
  0x66   :  { %821 = vmatprep.mubr.f32.mxu0 %v107_v28  ;;  %875 = vmatpush3.msra.mxu0 %v393_v43 }
  0x67   :  { %876 = vmatprep.subr.mxu0 %v392_v44 }
  0x68   :  { %877 = vmatpush3.msra.mxu0 %v392_v44 }
  0x69   :  { %822 = vmatmul.mubr.f32.gmra.mxu0 %v108_v29  ;;  %878 = vmatprep.subr.mxu0 %v391_v45 }
  0x6a   :  { %879 = vmatpush3.msra.mxu0 %v391_v45 }
  0x6b   :  { %880 = vmatprep.subr.mxu0 %v390_v7 }
  0x6c   :  { %881 = vmatpush3.msra.mxu0 %v390_v7 }
  0x6d   :  { %882 = vmatprep.subr.mxu0 %v389_v8 }
  0x6e   :  { %883 = vmatpush3.msra.mxu0 %v389_v8 }
  0x6f   :  { %884 = vmatprep.subr.mxu0 %v388_v9 }
  0x70   :  { %885 = vmatpush3.msra.mxu0 %v388_v9 }
  0x71   :  { %886 = vmatprep.subr.mxu0 %v387_v10 }
  0x72   :  { %887 = vmatpush3.msra.mxu0 %v387_v10 }
  0x73   :  { %888 = vmatprep.subr.mxu0 %v386_v11 }
  0x74   :  { %889 = vmatpush3.msra.mxu0 %v386_v11 }
  0x75   :  { %890 = vmatprep.subr.mxu0 %v385_v12 }
  0x76   :  { %891 = vmatpush3.msra.mxu0 %v385_v12 }
  0x77   :  { %892 = vmatprep.subr.mxu0 %v384_v13 }
  0x78   :  { %893 = vmatpush3.msra.mxu0 %v384_v13 }
  0x79   :  { %894 = vmatprep.subr.mxu0 %v383_v14 }
  0x7a   :  { %895 = vmatpush3.msra.mxu0 %v383_v14 }
  0x7b   :  { %896 = vmatprep.subr.mxu0 %v382_v15 }
  0x7c   :  { %897 = vmatpush3.msra.mxu0 %v382_v15 }
  0x7d   :  { %898 = vmatprep.subr.mxu0 %v381_v16 }
  0x7e   :  { %899 = vmatpush3.msra.mxu0 %v381_v16 }
 0x11d   :  { %v814_v47 = vpop.f32.mrf.mxu0 }
 0x11e   :  { %v204_v48 = vadd.f32 %v814_v47, %v680_v46 }
 0x11f   :  { %v198_v49 = vpop.f32.mrf.mxu0 }
 0x120   :  { %v199_v50 = vadd.f32 %v680_v46, %v198_v49  ;;  %v525_v49 = vld [vmem:[#allocation10 + $0x40] sm:$0xff] }
 0x121   :  { %v817_v51 = vpop.f32.mrf.mxu0 }
 0x122   :  { %964 = vtanh.f32 %v199_v50  ;;  %v214_v52 = vadd.f32 %v817_v51, %v680_v46  ;;  %v524_v50 = vld [vmem:[#allocation10 + $0x38] sm:$0xff]  ;;  %v523_v51 = vld [vmem:[#allocation10 + $0x30] sm:$0xff] }
 0x123   :  { %966 = vtanh.f32 %v204_v48  ;;  %v208_v53 = vpop.f32.mrf.mxu0  ;;  %v526_v48 = vld [vmem:[#allocation10 + $0x48] sm:$0xff] }
 0x124   :  { %v209_v54 = vadd.f32 %v680_v46, %v208_v53  ;;  %v521_v53 = vld [vmem:[#allocation10 + $0x20] sm:$0xff] }
 0x125   :  { %v820_v55 = vpop.f32.mrf.mxu0 }
 0x126   :  { %968 = vtanh.f32 %v209_v54  ;;  %v224_v56 = vadd.f32 %v820_v55, %v680_v46  ;;  %v520_v54 = vld [vmem:[#allocation10 + $0x18] sm:$0xff]  ;;  %v519_v55 = vld [vmem:[#allocation10 + $0x10] sm:$0xff] }
 0x127   :  { %970 = vtanh.f32 %v214_v52  ;;  %v218_v57 = vpop.f32.mrf.mxu0  ;;  %v522_v52 = vld [vmem:[#allocation10 + $0x28] sm:$0xff] }
 0x128   :  { %v219_v58 = vadd.f32 %v680_v46, %v218_v57  ;;  %v517_v57 = vld [vmem:[#allocation10] sm:$0xff] }
 0x129   :  { %v823_v59 = vpop.f32.mrf.mxu0 }
 0x12a   :  { %972 = vtanh.f32 %v219_v58  ;;  %v234_v60 = vadd.f32 %v823_v59, %v680_v46  ;;  %v682_v58 = vld [vmem:[%s1268_s6] ss:$0 sm:$0xff] }
 0x12b   :  { %974 = vtanh.f32 %v224_v56  ;;  %v228_v61 = vpop.f32.mrf.mxu0  ;;  %v518_v56 = vld [vmem:[#allocation10 + $0x8] sm:$0xff] }
 0x12c   :  { %v229_v62 = vadd.f32 %v680_v46, %v228_v61 }
 0x12e   :  { %976 = vtanh.f32 %v229_v62 }
 0x12f   :  { %v965_v63 = vpop.eup %964  ;;  %978 = vtanh.f32 %v234_v60 }
 0x130   :  { %v967_v0 = vpop.eup %966  ;;  %856 = vmatprep.mubr.f32.mxu1 %v965_v63 }
 0x131   :  { %857 = vmatmul.mubr.f32.vlgmr.msra.gmra.mxu1 %v967_v0 }
 0x132   :  { %913 = vmatpush3.msra.mxu1 %v532_v17 }
 0x133   :  { %v969_v1 = vpop.eup %968  ;;  %914 = vmatprep.subr.mxu1 %v531_v18 }
 0x134   :  { %v971_v2 = vpop.eup %970  ;;  %859 = vmatprep.mubr.f32.mxu1 %v969_v1  ;;  %915 = vmatpush3.msra.mxu1 %v531_v18 }
 0x135   :  { %860 = vmatmul.mubr.f32.gmra.mxu1 %v971_v2  ;;  %916 = vmatprep.subr.mxu1 %v530_v19 }
 0x136   :  { %917 = vmatpush3.msra.mxu1 %v530_v19  ;;  %v683_v19 = vld [vmem:[%s1270_s8] ss:$0 sm:$0xff]  ;;  %s1163_s8 = smov [#allocation11]  }
 0x137   :  { %v973_v3 = vpop.eup %972  ;;  %918 = vmatprep.subr.mxu1 %v529_v20  ;;  %s666_s17 = sshll.u32 %s1163_s8, 4  ;;  %s667_s17 = int_to_ptr.vmem [resolvable:$true] %s666_s17 }
 0x138   :  { %v975_v4 = vpop.eup %974  ;;  %862 = vmatprep.mubr.f32.mxu1 %v973_v3  ;;  %919 = vmatpush3.msra.mxu1 %v529_v20  ;;  %s1128_s18 = scalar_lea.vmem %s667_s17, 1024  ;;  %p1133_p12 = scmp.lt.s32.totalorder %s667_s17, %s667_s17 }
 0x139   :  { %863 = vmatmul.mubr.f32.gmra.mxu1 %v975_v4  ;;  %920 = vmatprep.subr.mxu1 %v528_v21  ;;  %p1129_p11 = scmp.ne.s32.totalorder %s667_s17, %s1128_s18  ;;  %p1134_p13 = scmp.lt.s32.totalorder %s1128_s18, %s1128_s18 }
 0x13a   :  { %921 = vmatpush3.msra.mxu1 %v528_v21 }
 0x13b   :  { %v977_v5 = vpop.eup %976  ;;  %922 = vmatprep.subr.mxu1 %v527_v22  ;;  %p1135_p0 = por %p1134_p13, %p1133_p12 }
 0x13c   :  { %v979_v6 = vpop.eup %978  ;;  %865 = vmatprep.mubr.f32.mxu1 %v977_v5  ;;  %923 = vmatpush3.msra.mxu1 %v527_v22 }
 0x13d   :  { %866 = vmatmul.mubr.f32.gmra.mxu1 %v979_v6  ;;  %924 = vmatprep.subr.mxu1 %v526_v48  ;;  %p1136_p1 = pnand %p1135_p0, %p1129_p11 }
 0x13e   :  { %925 = vmatpush3.msra.mxu1 %v526_v48 }
 0x13f   :  { %926 = vmatprep.subr.mxu1 %v525_v49 }
 0x140   :  { %927 = vmatpush3.msra.mxu1 %v525_v49 }
 0x141   :  { %928 = vmatprep.subr.mxu1 %v524_v50 }
 0x142   :  { %929 = vmatpush3.msra.mxu1 %v524_v50 }
 0x143   :  { %930 = vmatprep.subr.mxu1 %v523_v51 }
 0x144   :  { %931 = vmatpush3.msra.mxu1 %v523_v51 }
 0x145   :  { %932 = vmatprep.subr.mxu1 %v522_v52 }
 0x146   :  { %933 = vmatpush3.msra.mxu1 %v522_v52 }
 0x147   :  { %934 = vmatprep.subr.mxu1 %v521_v53 }
 0x148   :  { %935 = vmatpush3.msra.mxu1 %v521_v53 }
 0x149   :  { %936 = vmatprep.subr.mxu1 %v520_v54 }
 0x14a   :  { %937 = vmatpush3.msra.mxu1 %v520_v54 }
 0x14b   :  { %938 = vmatprep.subr.mxu1 %v519_v55 }
 0x14c   :  { %939 = vmatpush3.msra.mxu1 %v519_v55 }
 0x14d   :  { %940 = vmatprep.subr.mxu1 %v518_v56 }
 0x14e   :  { %941 = vmatpush3.msra.mxu1 %v518_v56 }
 0x14f   :  { %942 = vmatprep.subr.mxu1 %v517_v57 }
 0x150   :  { %943 = vmatpush3.msra.mxu1 %v517_v57 }
 0x1f1   :  { %v858_v24 = vpop.f32.mrf.mxu1 }
 0x1f2   :  { %v340_v25 = vadd.f32 %v858_v24, %v681_v23 }
 0x1f3   :  { %v334_v26 = vpop.f32.mrf.mxu1 }
 0x1f4   :  { %v335_v27 = vadd.f32 %v681_v23, %v334_v26 }
 0x1f5   :  { %v861_v28 = vpop.f32.mrf.mxu1 }
 0x1f6   :  { %980 = vtanh.f32 %v335_v27  ;;  %v350_v29 = vadd.f32 %v861_v28, %v681_v23 }
 0x1f7   :  { %982 = vtanh.f32 %v340_v25  ;;  %v344_v30 = vpop.f32.mrf.mxu1 }
 0x1f8   :  { %v345_v31 = vadd.f32 %v681_v23, %v344_v30 }
 0x1f9   :  { %v864_v32 = vpop.f32.mrf.mxu1 }
 0x1fa   :  { %984 = vtanh.f32 %v345_v31  ;;  %v360_v33 = vadd.f32 %v864_v32, %v681_v23 }
 0x1fb   :  { %986 = vtanh.f32 %v350_v29  ;;  %v354_v34 = vpop.f32.mrf.mxu1 }
 0x1fc   :  { %v355_v35 = vadd.f32 %v681_v23, %v354_v34 }
 0x1fd   :  { %v867_v36 = vpop.f32.mrf.mxu1 }
 0x1fe   :  { %988 = vtanh.f32 %v355_v35  ;;  %v370_v37 = vadd.f32 %v867_v36, %v681_v23 }
 0x1ff   :  { %990 = vtanh.f32 %v360_v33  ;;  %v364_v38 = vpop.f32.mrf.mxu1 }
 0x200   :  { %v365_v39 = vadd.f32 %v681_v23, %v364_v38 }
 0x202   :  { %992 = vtanh.f32 %v365_v39 }
 0x203   :  { %v981_v40 = vpop.eup %980  ;;  %994 = vtanh.f32 %v370_v37 }
 0x204   :  { %v983_v41 = vpop.eup %982  ;;  %900 = vmatprep.mubr.f32.mxu0 %v981_v40 }
 0x205   :  { %901 = vmatmul.mubr.f32.vlgmr.msra.gmra.mxu0 %v983_v41 }
 0x207   :  { %v985_v42 = vpop.eup %984 }
 0x208   :  { %v987_v43 = vpop.eup %986  ;;  %903 = vmatprep.mubr.f32.mxu0 %v985_v42 }
 0x209   :  { %904 = vmatmul.mubr.f32.gmra.mxu0 %v987_v43 }
 0x20b   :  { %v989_v44 = vpop.eup %988 }
 0x20c   :  { %v991_v45 = vpop.eup %990  ;;  %906 = vmatprep.mubr.f32.mxu0 %v989_v44 }
 0x20d   :  { %907 = vmatmul.mubr.f32.gmra.mxu0 %v991_v45 }
 0x20f   :  { %v993_v46 = vpop.eup %992 }
 0x210   :  { %v995_v47 = vpop.eup %994  ;;  %909 = vmatprep.mubr.f32.mxu0 %v993_v46 }
 0x211   :  { %910 = vmatmul.mubr.f32.gmra.mxu0 %v995_v47 }
 0x2c5   :  { %v902_v59 = vpop.f32.mrf.mxu0 }
 0x2c6   :  { %v476_v60 = vadd.f32 %v902_v59, %v682_v58 }
 0x2c7   :  { %v470_v61 = vpop.f32.mrf.mxu0 }
 0x2c8   :  { %v471_v62 = vadd.f32 %v682_v58, %v470_v61 }
 0x2c9   :  { %v905_v63 = vpop.f32.mrf.mxu0 }
 0x2ca   :  { %996 = vtanh.f32 %v471_v62  ;;  %v486_v0 = vadd.f32 %v905_v63, %v682_v58 }
 0x2cb   :  { %998 = vtanh.f32 %v476_v60  ;;  %v480_v1 = vpop.f32.mrf.mxu0 }
 0x2cc   :  { %v481_v2 = vadd.f32 %v682_v58, %v480_v1 }
 0x2cd   :  { %v908_v3 = vpop.f32.mrf.mxu0 }
 0x2ce   :  { %1000 = vtanh.f32 %v481_v2  ;;  %v496_v4 = vadd.f32 %v908_v3, %v682_v58 }
 0x2cf   :  { %1002 = vtanh.f32 %v486_v0  ;;  %v490_v5 = vpop.f32.mrf.mxu0 }
 0x2d0   :  { %v491_v6 = vadd.f32 %v682_v58, %v490_v5 }
 0x2d1   :  { %v911_v7 = vpop.f32.mrf.mxu0 }
 0x2d2   :  { %1004 = vtanh.f32 %v491_v6  ;;  %v506_v8 = vadd.f32 %v911_v7, %v682_v58 }
 0x2d3   :  { %1006 = vtanh.f32 %v496_v4  ;;  %v500_v9 = vpop.f32.mrf.mxu0 }
 0x2d4   :  { %v501_v10 = vadd.f32 %v682_v58, %v500_v9 }
 0x2d6   :  { %1008 = vtanh.f32 %v501_v10 }
 0x2d7   :  { %v997_v11 = vpop.eup %996  ;;  %1010 = vtanh.f32 %v506_v8 }
 0x2d8   :  { %v999_v12 = vpop.eup %998  ;;  %944 = vmatprep.mubr.f32.mxu1 %v997_v11 }
 0x2d9   :  { %945 = vmatmul.mubr.f32.vlgmr.msra.gmra.mxu1 %v999_v12 }
 0x2db   :  { %v1001_v13 = vpop.eup %1000 }
 0x2dc   :  { %v1003_v14 = vpop.eup %1002  ;;  %947 = vmatprep.mubr.f32.mxu1 %v1001_v13 }
 0x2dd   :  { %948 = vmatmul.mubr.f32.gmra.mxu1 %v1003_v14 }
 0x2df   :  { %v1005_v15 = vpop.eup %1004 }
 0x2e0   :  { %v1007_v16 = vpop.eup %1006  ;;  %950 = vmatprep.mubr.f32.mxu1 %v1005_v15 }
 0x2e1   :  { %951 = vmatmul.mubr.f32.gmra.mxu1 %v1007_v16 }
 0x2e3   :  { %v1009_v17 = vpop.eup %1008 }
 0x2e4   :  { %v1011_v18 = vpop.eup %1010  ;;  %953 = vmatprep.mubr.f32.mxu1 %v1009_v17 }
 0x2e5   :  { %954 = vmatmul.mubr.f32.gmra.mxu1 %v1011_v18 }
 0x399   :  { %v946_v20 = vpop.f32.mrf.mxu1 }
 0x39a   :  { %v612_v21 = vadd.f32 %v946_v20, %v683_v19 }
 0x39b   :  { %v606_v22 = vpop.f32.mrf.mxu1 }
 0x39c   :  { %1012 = vtanh.f32 %v612_v21  ;;  %v607_v23 = vadd.f32 %v683_v19, %v606_v22 }
 0x39d   :  { %v949_v24 = vpop.f32.mrf.mxu1 }
 0x39e   :  { %1014 = vtanh.f32 %v607_v23  ;;  %v622_v25 = vadd.f32 %v949_v24, %v683_v19 }
 0x39f   :  { %v616_v26 = vpop.f32.mrf.mxu1 }
 0x3a0   :  { %1016 = vtanh.f32 %v622_v25  ;;  %v617_v27 = vadd.f32 %v683_v19, %v616_v26 }
 0x3a1   :  { %v952_v28 = vpop.f32.mrf.mxu1 }
 0x3a2   :  { %1018 = vtanh.f32 %v617_v27  ;;  %v632_v29 = vadd.f32 %v952_v28, %v683_v19 }
 0x3a3   :  { %v626_v30 = vpop.f32.mrf.mxu1 }
 0x3a4   :  { %1020 = vtanh.f32 %v632_v29  ;;  %v627_v31 = vadd.f32 %v683_v19, %v626_v30 }
 0x3a5   :  { %v955_v32 = vpop.f32.mrf.mxu1 }
 0x3a6   :  { %1022 = vtanh.f32 %v627_v31  ;;  %v642_v33 = vadd.f32 %v955_v32, %v683_v19 }
 0x3a7   :  { %v636_v34 = vpop.f32.mrf.mxu1 }
 0x3a8   :  { %1024 = vtanh.f32 %v642_v33  ;;  %v637_v35 = vadd.f32 %v683_v19, %v636_v34 }
 0x3a9   :  { %v1013_v36 = vpop.eup %1012 }
 0x3aa   :  { %654 = vst [vmem:[#allocation11 + $0x8] sm:$0xff] %v1013_v36  ;;  %1026 = vtanh.f32 %v637_v35 }
 0x3ab   :  { %v1015_v37 = vpop.eup %1014 }
 0x3ac   :  { %653 = vst [vmem:[#allocation11] sm:$0xff] %v1015_v37 }
 0x3ad   :  { %v1017_v38 = vpop.eup %1016 }
 0x3ae   :  { %656 = vst [vmem:[#allocation11 + $0x18] sm:$0xff] %v1017_v38 }
 0x3af   :  { %v1019_v39 = vpop.eup %1018 }
 0x3b0   :  { %655 = vst [vmem:[#allocation11 + $0x10] sm:$0xff] %v1019_v39 }
 0x3b1   :  { %v1021_v40 = vpop.eup %1020 }
 0x3b2   :  { %658 = vst [vmem:[#allocation11 + $0x28] sm:$0xff] %v1021_v40 }
 0x3b3   :  { %v1023_v41 = vpop.eup %1022 }
 0x3b4   :  { %657 = vst [vmem:[#allocation11 + $0x20] sm:$0xff] %v1023_v41 }
 0x3b5   :  { %v1025_v42 = vpop.eup %1024 }
 0x3b6   :  { %660 = vst [vmem:[#allocation11 + $0x38] sm:$0xff] %v1025_v42 }
 0x3b7   :  { %v1027_v43 = vpop.eup %1026 }
 0x3b8   :  { %659 = vst [vmem:[#allocation11 + $0x30] sm:$0xff] %v1027_v43 }
 0x3b9   :  { %1139 = shalt.err (!%p1136_p1)
}
 0x3ba   :  { %672 = dma.vmem_to_hbm [thread:$0]  %s667_s17, 1024, %s1271_s9, [#allocation4], %s1158_s14, %s1158_s14, %s1159_s15  }
 0x3bb   :  { %1154 = dma.done.wait [#allocation4], 1024  }
 0x3bc   :  { %1155 = vsyncadd [#allocation4], 4294966272 }
 0x3bd   :  { %676 = vsyncpa [#allocation3], 1 }
 0x3be   :  { %677 = vsyncpa [#allocation6], 1 }
 0x3bf   :  { %678 = vsyncpa [#allocation9], 1 }
 0x3c0   :  { %679 = vsyncpa [#allocation4], 1 }

</bundles_post_ra>
